<compile_context>
chip_gen: v5e
topology: v5e:2x2
jax: 0.10.0
libtpu: 0.0.40
codegen_flags: <defaults>
</compile_context>

<pallas_src>
import functools
import math

import jax
import jax.numpy as jnp
from jax.experimental import pallas as pl
from jax.experimental.pallas import tpu as pltpu

_EPS = 1e-7
_LOG_EPS = math.log(_EPS)
_LOG_ONE_MINUS_EPS = math.log(1.0 - _EPS)


def _focal_loss_kernel(loc_p_ref, loc_t_ref, cls_p_ref, cls_t_ref, out_ref,
                       loc_acc, cls_acc, npos_acc, *, gamma, alpha):
    i = pl.program_id(1)

    @pl.when(i == 0)
    def _init():
        loc_acc[...] = jnp.zeros_like(loc_acc)
        cls_acc[...] = jnp.zeros_like(cls_acc)
        npos_acc[...] = jnp.zeros_like(npos_acc)

    y = cls_t_ref[...]                                   # (TN, 1) int32
    pos = (y > 0).astype(jnp.float32)                    # (TN, 1)

    # ---- SmoothL1 loss on positive anchors (sum reduction) ----
    diff = (loc_p_ref[...].astype(jnp.float32)
            - loc_t_ref[...].astype(jnp.float32))        # (TN, 4)
    ad = jnp.abs(diff)
    sl1 = jnp.where(ad < 1.0, 0.5 * diff * diff, ad - 0.5)
    loc_acc[...] += jnp.sum(sl1 * pos, axis=0, keepdims=True)      # (1, 4)

    # ---- focal_loss_alt (one exp per element; log/recip per row) ----
    x = cls_p_ref[...].astype(jnp.float32)               # (TN, C)
    n_rows, n_cls = x.shape
    m = jnp.max(x, axis=-1, keepdims=True)
    xm = x - m
    e = jnp.exp(xm)
    se = jnp.sum(e, axis=-1, keepdims=True)              # (TN, 1)
    logit = e * (1.0 / se)
    # log(clip(softmax, eps, 1-eps)) == clip(log_softmax, log eps, log(1-eps))
    log_p = jnp.clip(xm - jnp.log(se), _LOG_EPS, _LOG_ONE_MINUS_EPS)
    # 1 - clip(logit, eps, 1-eps) == clip(1-logit, eps, 1-eps)
    one_minus = jnp.clip(1.0 - logit, _EPS, 1.0 - _EPS)

    if gamma == 2.0:
        focal_w = one_minus * one_minus
    elif float(gamma).is_integer() and gamma >= 1.0:
        focal_w = one_minus
        for _ in range(int(gamma) - 1):
            focal_w = focal_w * one_minus
    else:
        focal_w = one_minus ** gamma

    # one_hot_embedding(y, 1+C)[:, 1:] -> t[i,k] = 1 iff y[i] == k+1.
    # Rows with y in {0, -1} give t == 0 everywhere, so the explicit pos_neg
    # mask of the reference is redundant.
    col = jax.lax.broadcasted_iota(jnp.int32, (n_rows, n_cls), 1)
    t = (col == (y - 1)).astype(jnp.float32)
    fl = (-alpha) * t * log_p * focal_w
    cls_acc[...] += jnp.sum(fl, axis=0, keepdims=True)             # (1, C)

    npos_acc[...] += jnp.sum(pos, axis=0, keepdims=True)           # (1, 1)

    @pl.when(i == pl.num_programs(1) - 1)
    def _finalize():
        loc_s = jnp.sum(loc_acc[...])
        cls_s = jnp.sum(cls_acc[...])
        np_s = jnp.sum(npos_acc[...])
        lane = jax.lax.broadcasted_iota(jnp.int32, out_ref.shape, 2)
        out_ref[...] = jnp.where(
            lane == 0, loc_s,
            jnp.where(lane == 1, cls_s,
                      jnp.where(lane == 2, np_s, 0.0)))


def _round_up(x, m):
    return ((x + m - 1) // m) * m


def focal_loss_forward(loc_preds, loc_targets, cls_preds, cls_targets,
                       *, gamma=2.0, balance_alpha=0.25,
                       tile_rows=1024, n_split=2):
    """Pallas FocalLoss.forward.

    Inputs: loc_preds/loc_targets [B,A,4], cls_preds [B,A,C],
            cls_targets [B,A] int (values in {-1, 0, 1..C}).
    """
    B, A, _ = loc_preds.shape
    C = cls_preds.shape[-1]
    N = B * A

    # Shrink the tile for tiny problems; keep a multiple of 8 sublanes.
    tile_rows = max(8, min(int(tile_rows), _round_up(pl.cdiv(N, n_split), 8)))
    steps = pl.cdiv(N, n_split * tile_rows)
    n_pad = n_split * steps * tile_rows

    lp = loc_preds.reshape(N, 4)
    lt = loc_targets.reshape(N, 4)
    cp = cls_preds.reshape(N, C)
    ct = cls_targets.reshape(N, 1).astype(jnp.int32)
    if n_pad != N:
        pad = n_pad - N
        lp = jnp.pad(lp, ((0, pad), (0, 0)))
        lt = jnp.pad(lt, ((0, pad), (0, 0)))
        cp = jnp.pad(cp, ((0, pad), (0, 0)))
        # y = -1 padding rows contribute 0 to loc/cls/num_pos sums.
        ct = jnp.pad(ct, ((0, pad), (0, 0)), constant_values=-1)

    kernel = functools.partial(_focal_loss_kernel,
                               gamma=float(gamma), alpha=float(balance_alpha))

    def row_map(c, i):
        return (c * steps + i, 0)

    parts = pl.pallas_call(
        kernel,
        out_shape=jax.ShapeDtypeStruct((n_split, 8, 128), jnp.float32),
        grid_spec=pltpu.PrefetchScalarGridSpec(
            num_scalar_prefetch=0,
            grid=(n_split, steps),
            in_specs=[
                pl.BlockSpec((tile_rows, 4), row_map),
                pl.BlockSpec((tile_rows, 4), row_map),
                pl.BlockSpec((tile_rows, C), row_map),
                pl.BlockSpec((tile_rows, 1), row_map),
            ],
            out_specs=pl.BlockSpec((1, 8, 128), lambda c, i: (c, 0, 0)),
            scratch_shapes=[
                pltpu.VMEM((1, 4), jnp.float32),   # loc partial (per-coord)
                pltpu.VMEM((1, C), jnp.float32),   # cls partial (per-class)
                pltpu.VMEM((1, 1), jnp.float32),   # num_pos partial
            ],
        ),
        compiler_params=pltpu.CompilerParams(
            dimension_semantics=("parallel", "arbitrary")),
    )(lp, lt, cp, ct)

    loc_loss = jnp.sum(parts[:, 0, 0])
    cls_loss = jnp.sum(parts[:, 0, 1])
    num_pos = jnp.maximum(jnp.sum(parts[:, 0, 2]), 1.0)
    return (loc_loss + cls_loss) / num_pos


def _reference(loc_preds, loc_targets, cls_preds, cls_targets,
               gamma=2.0, alpha=0.25):
    """Pure-JAX reference mirroring the PyTorch forward (naive formula)."""
    C = cls_preds.shape[-1]
    y = cls_targets.astype(jnp.int32)
    pos = (y > 0).astype(jnp.float32)[..., None]
    pos_neg = (y > -1).astype(jnp.float32)[..., None]

    diff = loc_preds - loc_targets
    ad = jnp.abs(diff)
    sl1 = jnp.where(ad < 1.0, 0.5 * diff * diff, ad - 0.5)
    loc_loss = jnp.sum(sl1 * pos)

    logit = jax.nn.softmax(cls_preds, axis=-1)
    logit = jnp.clip(logit, 1e-7, 1.0 - 1e-7)
    t = jax.nn.one_hot(y, C + 1, dtype=jnp.float32)[..., 1:]
    fl = alpha * (-t * jnp.log(logit)) * (1.0 - logit) ** gamma
    cls_loss = jnp.sum(fl * pos_neg)

    num_pos = jnp.maximum(jnp.sum(pos), 1.0)
    return loc_loss / num_pos + cls_loss / num_pos


if __name__ == "__main__":
    B, A, C = 2, 16, 20   # small: batch=2, 16 anchors, 20 classes
    key = jax.random.PRNGKey(0)
    k1, k2, k3, k4 = jax.random.split(key, 4)

    loc_preds = jax.random.normal(k1, (B, A, 4), dtype=jnp.float32)
    loc_targets = jax.random.normal(k2, (B, A, 4), dtype=jnp.float32)
    cls_preds = jax.random.normal(k3, (B, A, C), dtype=jnp.float32)
    # targets in {-1 (ignore), 0 (background), 1..C (classes)}
    cls_targets = jax.random.randint(k4, (B, A), -1, C + 1, dtype=jnp.int32)

    loss = focal_loss_forward(loc_preds, loc_targets, cls_preds, cls_targets)
    loss = jax.block_until_ready(loss)

    ref = _reference(loc_preds, loc_targets, cls_preds, cls_targets)
    assert jnp.allclose(loss, ref, rtol=1e-5, atol=1e-5), (loss, ref)

    print("KERNEL_OK")
</pallas_src>

<mosaic_0001>
module attributes {stable_mosaic.version = 11 : i64} {
  func.func @_focal_loss_kernel(%arg0: i32, %arg1: i32, %arg2: memref<16x4xf32, #tpu.memory_space<vmem>>, %arg3: memref<16x4xf32, #tpu.memory_space<vmem>>, %arg4: memref<16x20xf32, #tpu.memory_space<vmem>>, %arg5: memref<16x1xi32, #tpu.memory_space<vmem>>, %arg6: memref<1x8x128xf32, #tpu.memory_space<vmem>>, %arg7: memref<1x4xf32, #tpu.memory_space<vmem>>, %arg8: memref<1x20xf32, #tpu.memory_space<vmem>>, %arg9: memref<1x1xf32, #tpu.memory_space<vmem>>) attributes {dimension_semantics = [#tpu.dimension_semantics<parallel>, #tpu.dimension_semantics<arbitrary>], iteration_bounds = array<i64: 2, 1>, scalar_prefetch = 0 : i64, scratch_operands = 3 : i64, tpu.core_type = #tpu.core_type<tc>, window_params = [{transform_indices = @transform_0, window_bounds = array<i64: 16, 4>}, {transform_indices = @transform_1, window_bounds = array<i64: 16, 4>}, {transform_indices = @transform_2, window_bounds = array<i64: 16, 20>}, {transform_indices = @transform_3, window_bounds = array<i64: 16, 1>}, {transform_indices = @transform_4, window_bounds = array<i64: 1, 8, 128>}]} {
    %c0_i32 = arith.constant 0 : i32
    %0 = arith.cmpi eq, %arg1, %c0_i32 : i32
    %1 = arith.extui %0 : i1 to i32
    %c0_i32_0 = arith.constant 0 : i32
    %2 = arith.cmpi ne, %1, %c0_i32_0 : i32
    scf.if %2 {
      %cst_37 = arith.constant 0.000000e+00 : f32
      %77 = vector.broadcast %cst_37 : f32 to vector<1x4xf32>
      %c0_38 = arith.constant 0 : index
      %c0_39 = arith.constant 0 : index
      %78 = vector.load %arg7[%c0_38, %c0_39] : memref<1x4xf32, #tpu.memory_space<vmem>>, vector<1x4xf32>
      tpu.vector_store %arg7[%c0_38, %c0_39], %77 {strides = array<i32>} : memref<1x4xf32, #tpu.memory_space<vmem>>, vector<1x4xf32>,
      %cst_40 = arith.constant 0.000000e+00 : f32
      %79 = vector.broadcast %cst_40 : f32 to vector<1x20xf32>
      %c0_41 = arith.constant 0 : index
      %c0_42 = arith.constant 0 : index
      %80 = vector.load %arg8[%c0_41, %c0_42] : memref<1x20xf32, #tpu.memory_space<vmem>>, vector<1x20xf32>
      tpu.vector_store %arg8[%c0_41, %c0_42], %79 {strides = array<i32>} : memref<1x20xf32, #tpu.memory_space<vmem>>, vector<1x20xf32>,
      %cst_43 = arith.constant 0.000000e+00 : f32
      %81 = vector.broadcast %cst_43 : f32 to vector<1x1xf32>
      %c0_44 = arith.constant 0 : index
      %c0_45 = arith.constant 0 : index
      %82 = vector.load %arg9[%c0_44, %c0_45] : memref<1x1xf32, #tpu.memory_space<vmem>>, vector<1x1xf32>
      tpu.vector_store %arg9[%c0_44, %c0_45], %81 {strides = array<i32>} : memref<1x1xf32, #tpu.memory_space<vmem>>, vector<1x1xf32>,
    } else {
    }
    %c0 = arith.constant 0 : index
    %c0_1 = arith.constant 0 : index
    %3 = vector.load %arg5[%c0, %c0_1] : memref<16x1xi32, #tpu.memory_space<vmem>>, vector<16x1xi32>
    %c0_i32_2 = arith.constant 0 : i32
    %4 = vector.broadcast %c0_i32_2 : i32 to vector<16x1xi32>
    %5 = arith.cmpi sgt, %3, %4 : vector<16x1xi32>
    %6 = arith.extui %5 : vector<16x1xi1> to vector<16x1xi32>
    %7 = arith.sitofp %6 : vector<16x1xi32> to vector<16x1xf32>
    %c0_3 = arith.constant 0 : index
    %c0_4 = arith.constant 0 : index
    %8 = vector.load %arg2[%c0_3, %c0_4] : memref<16x4xf32, #tpu.memory_space<vmem>>, vector<16x4xf32>
    %c0_5 = arith.constant 0 : index
    %c0_6 = arith.constant 0 : index
    %9 = vector.load %arg3[%c0_5, %c0_6] : memref<16x4xf32, #tpu.memory_space<vmem>>, vector<16x4xf32>
    %10 = arith.subf %8, %9 : vector<16x4xf32>
    %11 = math.absf %10 : vector<16x4xf32>
    %cst = arith.constant 1.000000e+00 : f32
    %12 = vector.broadcast %cst : f32 to vector<16x4xf32>
    %13 = arith.cmpf olt, %11, %12 : vector<16x4xf32>
    %cst_7 = arith.constant 5.000000e-01 : f32
    %14 = vector.broadcast %cst_7 : f32 to vector<16x4xf32>
    %15 = arith.mulf %14, %10 : vector<16x4xf32>
    %16 = arith.mulf %15, %10 : vector<16x4xf32>
    %cst_8 = arith.constant 5.000000e-01 : f32
    %17 = vector.broadcast %cst_8 : f32 to vector<16x4xf32>
    %18 = arith.subf %11, %17 : vector<16x4xf32>
    %19 = arith.select %13, %16, %18 : vector<16x4xi1>, vector<16x4xf32>
    %c0_9 = arith.constant 0 : index
    %c0_10 = arith.constant 0 : index
    %20 = vector.load %arg7[%c0_9, %c0_10] : memref<1x4xf32, #tpu.memory_space<vmem>>, vector<1x4xf32>
    %21 = vector.broadcast %7 : vector<16x1xf32> to vector<16x4xf32>
    %22 = arith.mulf %19, %21 : vector<16x4xf32>
    %cst_11 = arith.constant dense<0.000000e+00> : vector<4xf32>
    %23 = vector.multi_reduction <add>, %22, %cst_11 [0] : vector<16x4xf32> to vector<4xf32>
    %24 = vector.shape_cast %23 : vector<4xf32> to vector<1x4xf32>
    %25 = arith.addf %20, %24 : vector<1x4xf32>
    %c0_12 = arith.constant 0 : index
    %c0_13 = arith.constant 0 : index
    %26 = vector.load %arg7[%c0_12, %c0_13] : memref<1x4xf32, #tpu.memory_space<vmem>>, vector<1x4xf32>
    tpu.vector_store %arg7[%c0_12, %c0_13], %25 {strides = array<i32>} : memref<1x4xf32, #tpu.memory_space<vmem>>, vector<1x4xf32>,
    %c0_14 = arith.constant 0 : index
    %c0_15 = arith.constant 0 : index
    %27 = vector.load %arg4[%c0_14, %c0_15] : memref<16x20xf32, #tpu.memory_space<vmem>>, vector<16x20xf32>
    %cst_16 = arith.constant dense<0xFF800000> : vector<16xf32>
    %28 = vector.multi_reduction <maximumf>, %27, %cst_16 [1] : vector<16x20xf32> to vector<16xf32>
    %29 = vector.shape_cast %28 : vector<16xf32> to vector<16x1xf32>
    %30 = vector.broadcast %29 : vector<16x1xf32> to vector<16x20xf32>
    %31 = arith.subf %27, %30 : vector<16x20xf32>
    %32 = math.exp %31 : vector<16x20xf32>
    %cst_17 = arith.constant dense<0.000000e+00> : vector<16xf32>
    %33 = vector.multi_reduction <add>, %32, %cst_17 [1] : vector<16x20xf32> to vector<16xf32>
    %34 = vector.shape_cast %33 : vector<16xf32> to vector<16x1xf32>
    %cst_18 = arith.constant 1.000000e+00 : f32
    %35 = vector.broadcast %cst_18 : f32 to vector<16x1xf32>
    %36 = arith.divf %35, %34 : vector<16x1xf32>
    %37 = vector.broadcast %36 : vector<16x1xf32> to vector<16x20xf32>
    %38 = arith.mulf %32, %37 : vector<16x20xf32>
    %39 = math.log %34 : vector<16x1xf32>
    %40 = vector.broadcast %39 : vector<16x1xf32> to vector<16x20xf32>
    %41 = arith.subf %31, %40 : vector<16x20xf32>
    %cst_19 = arith.constant -16.1180954 : f32
    %cst_20 = arith.constant -1.00000008E-7 : f32
    %42 = vector.broadcast %cst_19 : f32 to vector<16x20xf32>
    %43 = arith.maximumf %42, %41 : vector<16x20xf32>
    %44 = vector.broadcast %cst_20 : f32 to vector<16x20xf32>
    %45 = arith.minimumf %44, %43 : vector<16x20xf32>
    %cst_21 = arith.constant 1.000000e+00 : f32
    %46 = vector.broadcast %cst_21 : f32 to vector<16x20xf32>
    %47 = arith.subf %46, %38 : vector<16x20xf32>
    %cst_22 = arith.constant 1.000000e-07 : f32
    %cst_23 = arith.constant 0.99999988 : f32
    %48 = vector.broadcast %cst_22 : f32 to vector<16x20xf32>
    %49 = arith.maximumf %48, %47 : vector<16x20xf32>
    %50 = vector.broadcast %cst_23 : f32 to vector<16x20xf32>
    %51 = arith.minimumf %50, %49 : vector<16x20xf32>
    %52 = arith.mulf %51, %51 : vector<16x20xf32>
    %53 = tpu.iota {dimensions = array<i32: 1>} : vector<16x20xi32>
    %c1_i32 = arith.constant 1 : i32
    %54 = vector.broadcast %c1_i32 : i32 to vector<16x1xi32>
    %55 = arith.subi %3, %54 : vector<16x1xi32>
    %56 = vector.broadcast %55 : vector<16x1xi32> to vector<16x20xi32>
    %57 = arith.cmpi eq, %53, %56 : vector<16x20xi32>
    %58 = arith.extui %57 : vector<16x20xi1> to vector<16x20xi32>
    %59 = arith.sitofp %58 : vector<16x20xi32> to vector<16x20xf32>
    %cst_24 = arith.constant -2.500000e-01 : f32
    %60 = vector.broadcast %cst_24 : f32 to vector<16x20xf32>
    %61 = arith.mulf %60, %59 : vector<16x20xf32>
    %62 = arith.mulf %61, %45 : vector<16x20xf32>
    %63 = arith.mulf %62, %52 : vector<16x20xf32>
    %c0_25 = arith.constant 0 : index
    %c0_26 = arith.constant 0 : index
    %64 = vector.load %arg8[%c0_25, %c0_26] : memref<1x20xf32, #tpu.memory_space<vmem>>, vector<1x20xf32>
    %cst_27 = arith.constant dense<0.000000e+00> : vector<20xf32>
    %65 = vector.multi_reduction <add>, %63, %cst_27 [0] : vector<16x20xf32> to vector<20xf32>
    %66 = vector.shape_cast %65 : vector<20xf32> to vector<1x20xf32>
    %67 = arith.addf %64, %66 : vector<1x20xf32>
    %c0_28 = arith.constant 0 : index
    %c0_29 = arith.constant 0 : index
    %68 = vector.load %arg8[%c0_28, %c0_29] : memref<1x20xf32, #tpu.memory_space<vmem>>, vector<1x20xf32>
    tpu.vector_store %arg8[%c0_28, %c0_29], %67 {strides = array<i32>} : memref<1x20xf32, #tpu.memory_space<vmem>>, vector<1x20xf32>,
    %c0_30 = arith.constant 0 : index
    %c0_31 = arith.constant 0 : index
    %69 = vector.load %arg9[%c0_30, %c0_31] : memref<1x1xf32, #tpu.memory_space<vmem>>, vector<1x1xf32>
    %cst_32 = arith.constant dense<0.000000e+00> : vector<1xf32>
    %70 = vector.multi_reduction <add>, %7, %cst_32 [0] : vector<16x1xf32> to vector<1xf32>
    %71 = vector.shape_cast %70 : vector<1xf32> to vector<1x1xf32>
    %72 = arith.addf %69, %71 : vector<1x1xf32>
    %c0_33 = arith.constant 0 : index
    %c0_34 = arith.constant 0 : index
    %73 = vector.load %arg9[%c0_33, %c0_34] : memref<1x1xf32, #tpu.memory_space<vmem>>, vector<1x1xf32>
    tpu.vector_store %arg9[%c0_33, %c0_34], %72 {strides = array<i32>} : memref<1x1xf32, #tpu.memory_space<vmem>>, vector<1x1xf32>,
    %c0_i32_35 = arith.constant 0 : i32
    %74 = arith.cmpi eq, %arg1, %c0_i32_35 : i32
    %75 = arith.extui %74 : i1 to i32
    %c0_i32_36 = arith.constant 0 : i32
    %76 = arith.cmpi ne, %75, %c0_i32_36 : i32
    scf.if %76 {
      %c0_37 = arith.constant 0 : index
      %c0_38 = arith.constant 0 : index
      %77 = vector.load %arg7[%c0_37, %c0_38] : memref<1x4xf32, #tpu.memory_space<vmem>>, vector<1x4xf32>
      %78 = vector.shape_cast %77 : vector<1x4xf32> to vector<1x1x4xf32>
      %cst_39 = arith.constant dense<0.000000e+00> : vector<1xf32>
      %79 = vector.multi_reduction <add>, %78, %cst_39 [1, 2] : vector<1x1x4xf32> to vector<1xf32>
      %80 = vector.shape_cast %79 : vector<1xf32> to vector<1x1x1xf32>
      %81 = vector.extract %80[0, 0, 0] : f32 from vector<1x1x1xf32>
      %c0_40 = arith.constant 0 : index
      %c0_41 = arith.constant 0 : index
      %82 = vector.load %arg8[%c0_40, %c0_41] : memref<1x20xf32, #tpu.memory_space<vmem>>, vector<1x20xf32>
      %83 = vector.shape_cast %82 : vector<1x20xf32> to vector<1x1x20xf32>
      %cst_42 = arith.constant dense<0.000000e+00> : vector<1xf32>
      %84 = vector.multi_reduction <add>, %83, %cst_42 [1, 2] : vector<1x1x20xf32> to vector<1xf32>
      %85 = vector.shape_cast %84 : vector<1xf32> to vector<1x1x1xf32>
      %86 = vector.extract %85[0, 0, 0] : f32 from vector<1x1x1xf32>
      %c0_43 = arith.constant 0 : index
      %c0_44 = arith.constant 0 : index
      %87 = vector.load %arg9[%c0_43, %c0_44] : memref<1x1xf32, #tpu.memory_space<vmem>>, vector<1x1xf32>
      %88 = vector.shape_cast %87 : vector<1x1xf32> to vector<1x1x1xf32>
      %cst_45 = arith.constant dense<0.000000e+00> : vector<1xf32>
      %89 = vector.multi_reduction <add>, %88, %cst_45 [1, 2] : vector<1x1x1xf32> to vector<1xf32>
      %90 = vector.shape_cast %89 : vector<1xf32> to vector<1x1x1xf32>
      %91 = vector.extract %90[0, 0, 0] : f32 from vector<1x1x1xf32>
      %92 = tpu.iota {dimensions = array<i32: 2>} : vector<1x8x128xi32>
      %c0_i32_46 = arith.constant 0 : i32
      %93 = vector.broadcast %c0_i32_46 : i32 to vector<1x8x128xi32>
      %94 = arith.cmpi eq, %92, %93 : vector<1x8x128xi32>
      %c1_i32_47 = arith.constant 1 : i32
      %95 = vector.broadcast %c1_i32_47 : i32 to vector<1x8x128xi32>
      %96 = arith.cmpi eq, %92, %95 : vector<1x8x128xi32>
      %c2_i32 = arith.constant 2 : i32
      %97 = vector.broadcast %c2_i32 : i32 to vector<1x8x128xi32>
      %98 = arith.cmpi eq, %92, %97 : vector<1x8x128xi32>
      %cst_48 = arith.constant 0.000000e+00 : f32
      %99 = vector.broadcast %91 : f32 to vector<1x8x128xf32>
      %100 = vector.broadcast %cst_48 : f32 to vector<1x8x128xf32>
      %101 = arith.select %98, %99, %100 : vector<1x8x128xi1>, vector<1x8x128xf32>
      %102 = vector.broadcast %86 : f32 to vector<1x8x128xf32>
      %103 = arith.select %96, %102, %101 : vector<1x8x128xi1>, vector<1x8x128xf32>
      %104 = vector.broadcast %81 : f32 to vector<1x8x128xf32>
      %105 = arith.select %94, %104, %103 : vector<1x8x128xi1>, vector<1x8x128xf32>
      %c0_49 = arith.constant 0 : index
      %c0_50 = arith.constant 0 : index
      %c0_51 = arith.constant 0 : index
      %106 = vector.load %arg6[%c0_49, %c0_50, %c0_51] : memref<1x8x128xf32, #tpu.memory_space<vmem>>, vector<1x8x128xf32>
      tpu.vector_store %arg6[%c0_49, %c0_50, %c0_51], %105 {strides = array<i32>} : memref<1x8x128xf32, #tpu.memory_space<vmem>>, vector<1x8x128xf32>,
    } else {
    }
    return
  }
  func.func @transform_0(%arg0: i32, %arg1: i32) -> (i32, i32) {
    %c1_i32 = arith.constant 1 : i32
    %0 = arith.muli %arg0, %c1_i32 : i32
    %1 = arith.addi %0, %arg1 : i32
    %c0_i32 = arith.constant 0 : i32
    %c0_i32_0 = arith.constant 0 : i32
    return %1, %c0_i32 : i32, i32
  }
  func.func @transform_1(%arg0: i32, %arg1: i32) -> (i32, i32) {
    %c1_i32 = arith.constant 1 : i32
    %0 = arith.muli %arg0, %c1_i32 : i32
    %1 = arith.addi %0, %arg1 : i32
    %c0_i32 = arith.constant 0 : i32
    %c0_i32_0 = arith.constant 0 : i32
    return %1, %c0_i32 : i32, i32
  }
  func.func @transform_2(%arg0: i32, %arg1: i32) -> (i32, i32) {
    %c1_i32 = arith.constant 1 : i32
    %0 = arith.muli %arg0, %c1_i32 : i32
    %1 = arith.addi %0, %arg1 : i32
    %c0_i32 = arith.constant 0 : i32
    %c0_i32_0 = arith.constant 0 : i32
    return %1, %c0_i32 : i32, i32
  }
  func.func @transform_3(%arg0: i32, %arg1: i32) -> (i32, i32) {
    %c1_i32 = arith.constant 1 : i32
    %0 = arith.muli %arg0, %c1_i32 : i32
    %1 = arith.addi %0, %arg1 : i32
    %c0_i32 = arith.constant 0 : i32
    %c0_i32_0 = arith.constant 0 : i32
    return %1, %c0_i32 : i32, i32
  }
  func.func @transform_4(%arg0: i32, %arg1: i32) -> (i32, i32, i32) {
    %c0_i32 = arith.constant 0 : i32
    %c0_i32_0 = arith.constant 0 : i32
    %c0_i32_1 = arith.constant 0 : i32
    return %arg0, %c0_i32, %c0_i32_0 : i32, i32, i32
  }
}

</mosaic_0001>

<bundles_post_ra>
// kernel: tpu_custom_call.1
= control target key start
LH: loop header
LB: loop body
LE: loop exit
PB: predicated region body
PF: predicated region fallthrough
CT: control target
= control target key end

     0   :  { %9 = vsyncpa [#allocation6], 0  ;;  %s1016_s0 = inlined_call_operand.vmem [shape: f32[32,4], index: 0, kind: input, shape index: {}]   ;;  %s1017_s1 = inlined_call_operand.vmem [shape: f32[32,4], index: 1, kind: input, shape index: {}]   ;;  %s1018_s2 = inlined_call_operand.vmem [shape: f32[32,20], index: 2, kind: input, shape index: {}]   ;;  %s1019_s3 = inlined_call_operand.vmem [shape: s32[32,1], index: 3, kind: input, shape index: {}]   ;;  %s1020_s4 = inlined_call_operand.hbm [shape: f32[2,8,128], index: 4, kind: output, shape index: {}]  }
   0x1   :  { %11 = vsyncpa [#allocation6 + $0x1], 0  ;;  %s858_s15 = smov 0   ;;  %s860_s16 = smov 0  }
   0x2   :  { %s862_s17 = smov 0   ;;  %s864_s18 = smov 0  }
   0x3   :  { %s866_s19 = smov 0   ;;  %s868_s20 = smov 0  }
   0x4 LB: > { %s643_s21 = sadd.s32 4294967295, %s829_s20   ;;  %s644_s22 = sadd.s32 4294967294, %s829_s20   ;;  %s829_s20 = sphi %s868_s20, %s17_s20   ;;  %s825_s19 = sphi %s866_s19, %s1027_s19   ;;  %s821_s18 = sphi %s864_s18, %s1026_s18   ;;  %s817_s17 = sphi %s862_s17, %s1025_s17   ;;  %s813_s16 = sphi %s860_s16, %s1024_s16   ;;  %s809_s15 = sphi %s858_s15, %s1023_s15  }
   0x5   : > { %s29_s23 = sadd.s32 1, %s825_s19  ;;  %s148_s24 = sadd.s32 1, %s817_s17 }
   0x6   : > { %p31_p0 = scmp.ge.s32.totalorder %s29_s23, 2  ;;  %p158_p1 = scmp.ne.s32.totalorder %s817_s17, %s813_s16 }
   0x7   : > { %p159_p2 = scmp.eq.s32.totalorder %s643_s21, 1  ;;  %p164_p3 = scmp.ne.s32.totalorder %s813_s16, %s809_s15 }
   0x8   : > { %s1029_s23 = smov (%p31_p0, %s29_s23), 0  ;;  %p165_p5 = scmp.eq.s32.totalorder %s644_s22, 1 }
   0x9   : > { %p898_p4 = por %p159_p2, %p158_p1  ;;  %s145_s26 = ssub.s32 %s825_s19, %s1029_s23 }
   0xa   : > { %p647_p6 = scmp.ge.s32.totalorder %s829_s20, 1  ;;  %p146_p7 = scmp.eq.s32.totalorder %s145_s26, 0 }
   0xb   : > { %p905_p8 = por %p165_p5, %p164_p3  ;;  %p227_p9 = scmp.lt.s32.totalorder %s829_s20, 3 }
   0xc   : > { %s911_s28 = scalar_select %p146_p7, %s817_s17, %s148_s24  }
   0xd   : > { %p228_p10 = pnand %p647_p6, %p227_p9 }
   0xe   : > { %s649_s29 = sshll.u32 (!%p228_p10), %s821_s18, 1  ;;  %s269_s24 = sand.u32 (!%p228_p10), 1, %s813_s16  }
   0xf   : > { %231 = sbr.rel (%p228_p10) target bundleno = 518 (0x206), region = 36  ;;  %p274_p11 = scmp.lt.s32.totalorder (!%p228_p10), %s649_s29, 3 }
  0x10   : > { %s648_s26 = sshll.u32 (!%p228_p10), %s269_s24, 3 }
  0x11   : > { %s271_s9 = scalar_lea.vmem (!%p228_p10), [#allocation5], %s648_s26  ;;  %s771_s26 = scalar_lea.hbm (!%p228_p10), %s1020_s4, 16 }
  0x14   : > { %s1031_s29 = smov (!%p274_p11, %s649_s29), 3  ;;  %vm368_vm0 = vcmask 162816   ;;  %vm312_vm1 = vcmask 0   ;;  %vm473_vm2 = vcmask 7168   ;;  %v831_v6 = vmov 0  }
  0x15   : > { %s914_s30 = sshll.u32 %s1031_s29, 3  ;;  %733 = vset.pattern.permute.xlu0 %v831_v6  ;;  %v832_v7 = vmov 0.0   ;;  %732 = vset.pattern.permute.xlu2 %v831_v6  ;;  %vm353_vm7 = vcmask 31744   ;;  %vm308_vm8 = vcmask 24576   ;;  %vm310_vm11 = vcmask 155648   ;;  %s666_s29 = sshll.u32 %s821_s18, 3 }
  0x16   : > { %s293_s7 = scalar_lea.vmem %s1018_s2, %s914_s30  ;;  %s301_s10 = scalar_lea.vmem %s1019_s3, %s914_s30  ;;  %313 = vst.msk [vmem:[#allocation4] sm:$0x1] %vm312_vm1, %v832_v7 }
  0x17   : > { %v366_v0 = vld [vmem:[%s293_s7] sm:$0xff]  ;;  %v367_v2 = vld [vmem:[%s293_s7 + $0x8] sm:$0xff]  ;;  %s277_s13 = scalar_lea.vmem %s1016_s0, %s914_s30  ;;  %s285_s22 = scalar_lea.vmem %s1017_s1, %s914_s30  ;;  %309 = vst.msk [vmem:[#allocation2] sm:$0x1] %vm308_vm8, %v832_v7 }
  0x18   : > { %v369_v1 = vsel %vm368_vm0, %v366_v0, -inf  ;;  %v372_v3 = vsel %vm368_vm0, %v367_v2, -inf  ;;  %v314_v4 = vld [vmem:[%s301_s10] sm:$0xff]  ;;  %v315_v5 = vld [vmem:[%s301_s10 + $0x8] sm:$0xff]  ;;  %311 = vst.msk [vmem:[#allocation3] sm:$0x1] %vm310_vm11, %v832_v7  ;;  %s535_s6 = scalar_lea.hbm %s1020_s4, %s666_s29 }
  0x19   : > { %370 = vmax.xlane.f32.xlu0 %v369_v1  ;;  %vm316_vm3 = vcmp.gt.s32.totalorder %v314_v4, 0  ;;  %vm317_vm4 = vcmp.gt.s32.totalorder %v315_v5, 0  ;;  %v661_v8 = vadd.s32 4294967295, %v314_v4  ;;  %v662_v16 = vadd.s32 4294967295, %v315_v5  ;;  %v322_v34 = vld [vmem:[%s277_s13] sm:$0xff]  ;;  %v323_v35 = vld [vmem:[%s277_s13 + $0x8] sm:$0xff] }
  0x1a   : > { %v657_v9 = vsel %vm316_vm3, 1.0, %v832_v7  ;;  %v658_v10 = vsel %vm317_vm4, 1.0, %v832_v7  ;;  %v324_v36 = vld [vmem:[%s285_s22] sm:$0xff]  ;;  %v325_v37 = vld [vmem:[%s285_s22 + $0x8] sm:$0xff]  ;;  %s979_s10 = sshll.u32 %s271_s9, 4  ;;  %s539_s12 = sshll.u32 %s535_s6, 4  ;;  %s538_s10 = int_to_ptr.vmem [resolvable:$true] %s979_s10  ;;  %s540_s12 = int_to_ptr.hbm [resolvable:$true] %s539_s12 }
  0x1b   : > { %v475_v11 = vsel %vm473_vm2, %v658_v10, 0.0  ;;  %v734_v12 = vpack.i.bf16 %v658_v10, %v657_v9  ;;  %v474_v13 = vsel %vm473_vm2, %v657_v9, 0.0  ;;  %442 = vperm.xlu2 %732, %v661_v8   ;;  %v326_v38 = vsub.f32 %v322_v34, %v324_v36  ;;  %s525_s18 = scalar_lea.sflag [#allocation6], %s269_s24  ;;  %s765_s13 = sshra.s32 %s540_s12, 4  ;;  %s766_s13 = int_to_ptr.hbm [resolvable:$true] %s765_s13 }
  0x1c   : > { %v476_v14 = vadd.f32 %v475_v11, %v474_v13  ;;  %v327_v39 = vsub.f32 %v323_v35, %v325_v37  ;;  %s767_s14 = scalar_lea.hbm %s766_s13, 8  ;;  %p772_p1 = scmp.lt.s32.totalorder %s766_s13, %s1020_s4 }
  0x1d   : > { %v472_v24 = vld [vmem:[#allocation4] sm:$0x1]  ;;  %v328_v40 = vand.u32 2147483647, %v326_v38  ;;  %v332_v42 = vmul.f32 0.5, %v326_v38  ;;  %p768_p12 = scmp.ne.s32.totalorder %s766_s13, %s767_s14  ;;  %p773_p2 = scmp.lt.s32.totalorder %s771_s26, %s767_s14 }
  0x1e   : > { %v477_v15 = vrot.slane %v476_v14, 4  ;;  %v329_v41 = vand.u32 2147483647, %v327_v39  ;;  %v333_v43 = vmul.f32 0.5, %v327_v39  ;;  %v340_v6 = vld [vmem:[#allocation2] sm:$0x1] }
  0x1f   : > { %v334_v45 = vmul.f32 %v332_v42, %v326_v38  ;;  %v659_v47 = vadd.f32 -0.5, %v328_v40  ;;  %vm330_vm5 = vcmp.lt.f32.partialorder %v328_v40, 1.0  ;;  %p769_p13 = pnand %p768_p12, %p898_p4  ;;  %p774_p3 = por %p773_p2, %p772_p1 }
  0x20   : > { %v478_v17 = vadd.f32 %v477_v15, %v476_v14  ;;  %v335_v46 = vmul.f32 %v333_v43, %v327_v39  ;;  %vm331_vm6 = vcmp.lt.f32.partialorder %v329_v41, 1.0  ;;  %v660_v50 = vadd.f32 -0.5, %v329_v41 }
  0x21   : > { %373 = vmax.xlane.f32.xlu0 %v372_v3  ;;  %v338_v51 = vsel %vm330_vm5, %v334_v45, %v659_v47  ;;  %p770_p0 = pneg %p769_p13 }
  0x22   : > { %v479_v18 = vrot.slane %v478_v17, 2  ;;  %v339_v53 = vsel %vm331_vm6, %v335_v46, %v660_v50 }
  0x23   : > { %445 = vperm.xlu2 %732, %v662_v16   ;;  %p775_p5 = pnand %p774_p3, %p770_p0 }
  0x24   : > { %v480_v21 = vadd.f32 %v479_v18, %v478_v17 }
  0x26   : > { %v481_v23 = vrot.slane %v480_v21, 1 }
  0x28   : > { %v482_v25 = vadd.f32 %v481_v23, %v480_v21 }
  0x2a   : > { %v483_v26 = vadd.f32 %v482_v25, %v472_v24 }
  0x2c   : > { %485 = vst.msk [vmem:[#allocation4] sm:$0x1] %vm312_vm1, %v483_v26 }
  0x35   : > { %735 = vperm.xlu0 %733, %v734_v12   ;;  %v437_v12 = vlaneseq }
  0x75   : > { %v443_v3 = vpop.permute.xlu2 %442 }
  0x7d   : > { %v446_v35 = vpop.permute.xlu2 %445 }
  0x8c   : > { %v371_v19 = vpop.xlane.xlu0 %370 }
  0x8d   : > { %v930_v20 = vsub.f32 %v366_v0, %v371_v19 }
  0x8f   : > { %v377_v22 = vmul.f32 1.442695, %v930_v20 }
  0x91   : > { %739 = vpow2.f32 %v377_v22  ;;  %v958_v22 = vand.u32 127, %v437_v12 }
  0x93   : > { %vm447_vm15 = vcmp.eq.s32.totalorder %v958_v22, %v443_v3  ;;  %vm448_vm3 = vcmp.eq.s32.totalorder %v958_v22, %v446_v35  ;;  %vm515_vm5 = vcmp.eq.s32.totalorder %v958_v22, 1  ;;  %vm514_vm6 = vcmp.eq.s32.totalorder %v958_v22, 0 }
  0x94   : > { %v374_v27 = vpop.xlane.xlu0 %373 }
  0x95   : > { %v933_v28 = vsub.f32 %v367_v2, %v374_v27 }
  0x97   : > { %v936_v29 = vpop.eup %739  ;;  %v379_v30 = vmul.f32 1.442695, %v933_v28 }
  0x98   : > { %v381_v31 = vsel %vm368_vm0, %v936_v29, 0.0 }
  0x99   : > { %741 = vpow2.f32 %v379_v30  ;;  %382 = vadd.xlane.f32.xlu1 %v381_v31 }
  0x9f   : > { %v941_v32 = vpop.eup %741 }
  0xa0   : > { %v384_v33 = vsel %vm368_vm0, %v941_v32, 0.0 }
  0xa1   : > { %385 = vadd.xlane.f32.xlu1 %v384_v33 }
  0xa7   : > { %v736_v44 = vpop.permute.xlu0 %735 }
  0xa8   : > { %v738_v48 = vunpack.i.h.bf16 %v736_v44  ;;  %v737_v49 = vunpack.i.l.bf16 %v736_v44 }
  0xaa   : > { %v351_v52 = vmul.f32 %v737_v49, %v338_v51  ;;  %v352_v54 = vmul.f32 %v738_v48, %v339_v53 }
  0xac   : > { %v354_v55 = vsel %vm353_vm7, %v351_v52, 0.0  ;;  %v355_v56 = vsel %vm353_vm7, %v352_v54, 0.0 }
  0xad   : > { %v356_v57 = vadd.f32 %v355_v56, %v354_v55 }
  0xaf   : > { %v357_v59 = vrot.slane %v356_v57, 4 }
  0xb1   : > { %v358_v60 = vadd.f32 %v357_v59, %v356_v57 }
  0xb3   : > { %v359_v61 = vrot.slane %v358_v60, 2 }
  0xb5   : > { %v360_v1 = vadd.f32 %v359_v61, %v358_v60 }
  0xb7   : > { %v361_v4 = vrot.slane %v360_v1, 1 }
  0xb9   : > { %v362_v10 = vadd.f32 %v361_v4, %v360_v1 }
  0xbb   : > { %v363_v14 = vadd.f32 %v362_v10, %v340_v6 }
  0xbd   : > { %365 = vst.msk [vmem:[#allocation2] sm:$0x1] %vm308_vm8, %v363_v14 }
 0x10c   : > { %v383_v58 = vpop.xlane.xlu1 %382 }
 0x10d   : > { %743 = vrcp.f32 %v383_v58  ;;  %v398_v5 = vand.u32 2147483648, %v383_v58  ;;  %v396_v9 = vand.u32 2147483647, %v383_v58  ;;  %vm392_vm10 = vweird.f32 %v383_v58 }
 0x10e   : > { %745 = vlog2.f32 %v383_v58 }
 0x10f   : > { %v399_v16 = vor.u32 1.1754944e-38, %v398_v5  ;;  %vm397_vm13 = vcmp.eq.f32.partialorder %v396_v9, 8.507059e+37 }
 0x113   : > { %v744_v62 = vpop.eup %743 }
 0x114   : > { %v388_v63 = vmul.f32 %v744_v62, %v383_v58  ;;  %v386_v0 = vpop.xlane.xlu1 %385  ;;  %vm393_vm9 = vweird.f32 %v744_v62  ;;  %v746_v11 = vpop.eup %745 }
 0x115   : > { %747 = vrcp.f32 %v386_v0  ;;  %vm394_vm12 = vmor %vm392_vm10, %vm393_vm9  ;;  %v420_v21 = vmul.f32 0.6931472, %v746_v11  ;;  %v411_v27 = vand.u32 2147483647, %v386_v0  ;;  %v413_v30 = vand.u32 2147483648, %v386_v0 }
 0x116   : > { %v389_v2 = vsub.f32 1.0, %v388_v63  ;;  %749 = vlog2.f32 %v386_v0  ;;  %vm407_vm1 = vweird.f32 %v386_v0 }
 0x117   : > { %v423_v33 = vsub.f32 %v930_v20, %v420_v21  ;;  %v414_v39 = vor.u32 1.1754944e-38, %v413_v30  ;;  %vm412_vm4 = vcmp.eq.f32.partialorder %v411_v27, 8.507059e+37  ;;  %v663_v20 = vsel %vm447_vm15, 1.0, %v832_v7 }
 0x118   : > { %v390_v8 = vmul.f32 %v744_v62, %v389_v2  ;;  %v453_v48 = vmul.f32 -0.25, %v663_v20  ;;  %v459_v2 = vld [vmem:[#allocation3] sm:$0x1] }
 0x119   : > { %v425_v40 = vmax.f32 %v423_v33, -16.118095 }
 0x11a   : > { %v391_v13 = vadd.f32 %v744_v62, %v390_v8 }
 0x11b   : > { %v748_v15 = vpop.eup %747  ;;  %v427_v47 = vmin.f32 %v425_v40, -1.0000001e-07 }
 0x11c   : > { %v750_v17 = vpop.eup %749  ;;  %v403_v18 = vmul.f32 %v748_v15, %v386_v0  ;;  %v395_v19 = vsel %vm394_vm12, %v744_v62, %v391_v13  ;;  %vm408_vm14 = vweird.f32 %v748_v15 }
 0x11d   : > { %v400_v23 = vsel %vm397_vm13, %v399_v16, %v395_v19  ;;  %v422_v26 = vmul.f32 0.6931472, %v750_v17  ;;  %vm409_vm2 = vmor %vm407_vm1, %vm408_vm14  ;;  %v455_v54 = vmul.f32 %v453_v48, %v427_v47 }
 0x11e   : > { %v404_v24 = vsub.f32 1.0, %v403_v18  ;;  %v417_v25 = vmul.f32 %v936_v29, %v400_v23  ;;  %v489_v29 = vld [vmem:[#allocation2] sm:$0x1] }
 0x11f   : > { %v424_v38 = vsub.f32 %v933_v28, %v422_v26  ;;  %v490_v42 = vsel %vm308_vm8, %v489_v29, 0.0  ;;  %v664_v28 = vsel %vm448_vm3, 1.0, %v832_v7 }
 0x120   : > { %v405_v31 = vmul.f32 %v748_v15, %v404_v24  ;;  %v429_v34 = vsub.f32 1.0, %v417_v25  ;;  %491 = vadd.xlane.f32.xlu1 %v490_v42  ;;  %v454_v53 = vmul.f32 -0.25, %v664_v28  ;;  %v511_v24 = vld [vmem:[#allocation4] sm:$0x1] }
 0x121   : > { %v426_v46 = vmax.f32 %v424_v38, -16.118095 }
 0x122   : > { %v406_v36 = vadd.f32 %v748_v15, %v405_v31  ;;  %v431_v37 = vmax.f32 %v429_v34, 1e-07 }
 0x123   : > { %v428_v51 = vmin.f32 %v426_v46, -1.0000001e-07 }
 0x124   : > { %v410_v41 = vsel %vm409_vm2, %v748_v15, %v406_v36  ;;  %v433_v44 = vmin.f32 %v431_v37, 0.9999999 }
 0x125   : > { %v415_v43 = vsel %vm412_vm4, %v414_v39, %v410_v41  ;;  %v456_v58 = vmul.f32 %v454_v53, %v428_v51 }
 0x126   : > { %v418_v45 = vmul.f32 %v941_v32, %v415_v43  ;;  %v435_v50 = vmul.f32 %v433_v44, %v433_v44 }
 0x128   : > { %v430_v49 = vsub.f32 1.0, %v418_v45  ;;  %v457_v56 = vmul.f32 %v455_v54, %v435_v50 }
 0x12a   : > { %v432_v52 = vmax.f32 %v430_v49, 1e-07  ;;  %v460_v60 = vsel %vm368_vm0, %v457_v56, 0.0 }
 0x12c   : > { %v434_v55 = vmin.f32 %v432_v52, 0.9999999 }
 0x12e   : > { %v436_v57 = vmul.f32 %v434_v55, %v434_v55 }
 0x130   : > { %v458_v59 = vmul.f32 %v456_v58, %v436_v57 }
 0x132   : > { %v461_v32 = vsel %vm368_vm0, %v458_v59, 0.0  ;;  %vm516_vm0 = vcmp.eq.s32.totalorder %v958_v22, 2 }
 0x133   : > { %v462_v61 = vadd.f32 %v461_v32, %v460_v60 }
 0x135   : > { %v463_v62 = vrot.slane %v462_v61, 4 }
 0x137   : > { %v464_v7 = vadd.f32 %v463_v62, %v462_v61 }
 0x139   : > { %v465_v63 = vrot.slane %v464_v7, 2 }
 0x13b   : > { %v466_v0 = vadd.f32 %v465_v63, %v464_v7 }
 0x13d   : > { %v467_v1 = vrot.slane %v466_v0, 1 }
 0x13f   : > { %v468_v3 = vadd.f32 %v467_v1, %v466_v0 }
 0x141   : > { %v469_v4 = vadd.f32 %v468_v3, %v459_v2 }
 0x143   : > { %471 = vst.msk [vmem:[#allocation3] sm:$0x1] %vm310_vm11, %v469_v4 }
 0x14a   : > { %v500_v5 = vld [vmem:[#allocation3] sm:$0x1] }
 0x14b   : > { %v501_v6 = vsel %vm310_vm11, %v500_v5, 0.0 }
 0x14c   : > { %502 = vadd.xlane.f32.xlu2 %v501_v6 }
 0x193   : > { %v492_v8 = vpop.xlane.xlu1 %491 }
 0x194   : > { %v493_v9 = vrot.slane %v492_v8, 4 }
 0x196   : > { %v494_v10 = vadd.f32 %v493_v9, %v492_v8 }
 0x198   : > { %v495_v11 = vrot.slane %v494_v10, 2 }
 0x19a   : > { %v496_v12 = vadd.f32 %v495_v11, %v494_v10 }
 0x19c   : > { %v497_v13 = vrot.slane %v496_v12, 1 }
 0x19e   : > { %v498_v14 = vadd.f32 %v497_v13, %v496_v12 }
 0x1a0   : > { %669 = vpush %v498_v14 }
 0x1bf   : > { %v503_v15 = vpop.xlane.xlu2 %502 }
 0x1c0   : > { %v504_v16 = vrot.slane %v503_v15, 4 }
 0x1c2   : > { %v505_v17 = vadd.f32 %v504_v16, %v503_v15 }
 0x1c4   : > { %v506_v18 = vrot.slane %v505_v17, 2 }
 0x1c6   : > { %v507_v19 = vadd.f32 %v506_v18, %v505_v17 }
 0x1c8   : > { %v508_v21 = vrot.slane %v507_v19, 1 }
 0x1ca   : > { %v509_v23 = vadd.f32 %v508_v21, %v507_v19 }
 0x1cc   : > { %671 = vpush %v509_v23 }
 0x1cd   : > { %673 = vpush %v511_v24 }
 0x1d1   : > { %s670_s7 = spop %669 }
 0x1d2   : > { %v521_v30 = vstv %s670_s7 }
 0x1fd   : > { %s672_s8 = spop %671 }
 0x1fe   : > { %v519_v25 = vstv %s672_s8  ;;  %s674_s11 = spop %673 }
 0x1ff   : > { %v517_v26 = vstv %s674_s11 }
 0x200   : > { %v518_v27 = vsel %vm516_vm0, %v517_v26, 0.0 }
 0x201   : > { %v520_v31 = vsel %vm515_vm5, %v519_v25, %v518_v27 }
 0x202   : > { %v522_v33 = vsel %vm514_vm6, %v521_v30, %v520_v31 }
 0x203   : > { %523 = vst [vmem:[%s271_s9] sm:$0xff] %v522_v33 }
 0x204   : > { %778 = shalt.err (!%p775_p5)
}
 0x205   : > { %675 = dma.vmem_to_hbm [thread:$0]  (%p898_p4), %s538_s10, 128, %s540_s12, %s525_s18  }
 0x206 PF: > { %p681_p6 = scmp.ge.s32.totalorder %s829_s20, 2  ;;  %s551_s24 = sand.u32 1, %s809_s15  }
 0x207   : > { %s552_s5 = scalar_lea.sflag [#allocation6], %s551_s24 }
 0x208   : > { %p678_p7 = pnand %p681_p6, %p905_p8 }
 0x20a   : > { %p679_p9 = pneg %p678_p7 }
 0x20c   : > { %804 = dma.done.wait (%p679_p9), %s552_s5, 128  }
 0x20d   : > { %806 = vsyncadd (%p679_p9), %s552_s5, 4294967168  ;;  %s17_s20 = sadd.s32 1, %s829_s20   ;;  %s1023_s15 = smov %s813_s16 }
 0x20e   : > { %p14_p10 = scmp.ge.s32.totalorder %s17_s20, 4   ;;  %s1024_s16 = smov %s817_s17 }
 0x20f   : > { %s1025_s17 = smov %s911_s28  ;;  %s1026_s18 = smov %s825_s19 }
 0x210   : > { %s1027_s19 = smov %s1029_s23  ;;  %16 = sbr.rel (!%p14_p10) target bundleno = 4 (0x4), region = 88 }
 0x215   :  { %558 = vsyncpa [#allocation6], 1 }
 0x216   :  { %560 = vsyncpa [#allocation6 + $0x1], 1 }

</bundles_post_ra>
